<compile_context>
chip_gen: v7x
topology: tpu7x:2x2x1
jax: 0.10.0
libtpu: 0.0.40
codegen_flags: <defaults>
</compile_context>

<pallas_src>
import functools

import jax
import jax.numpy as jnp
from jax.experimental import pallas as pl
from jax.experimental.pallas import tpu as pltpu

LANE = 128            # lane width: last-dim granularity for dense stores / MXU tiles
SUBLANE = 16          # bf16 packs 16 rows per sublane group (also valid for f32: 16 % 8 == 0)
MAX_BATCH_TILE = 512  # diminishing returns past ~512 rows per step (HBM roofline ~85%)


def _round_up(x, m):
    return ((x + m - 1) // m) * m


def _pad_to(a, shape):
    pads = [(0, t - s) for s, t in zip(a.shape, shape)]
    if all(p == (0, 0) for p in pads):
        return a
    return jnp.pad(a, pads)


def _tpu_generation():
    """Returns (physical VMEM bytes per core, #TensorCores per chip), with fallbacks."""
    vmem_cap = 128 * 1024 * 1024   # v5e / v6e default
    num_tc = 1
    try:
        vmem_cap = int(pltpu.get_tpu_info().vmem_capacity_bytes)
    except Exception:
        pass
    try:
        kind = jax.devices()[0].device_kind.lower()
        if "v7" in kind:
            num_tc = 2
    except Exception:
        pass
    if vmem_cap <= 64 * 1024 * 1024:   # small-VMEM generation (v7x) has 2 TCs per chip
        num_tc = max(num_tc, 2)
    return vmem_cap, num_tc


def mlp_kernel(x_ref, w1_ref, b1_ref, w2_ref, b2_ref, w3_ref, b3_ref, o_ref, *,
               compute_dtype):
    # In-kernel cast of the x tile (VPU slot, hidden under the MXU) -- avoids a
    # separate wrapper-side HBM pad/cast pass over x.
    x = x_ref[...].astype(compute_dtype)
    # Layer 1: MXU matmul with f32 accumulation, bias + ReLU in f32.
    h = jnp.dot(x, w1_ref[...], preferred_element_type=jnp.float32)
    h = jnp.maximum(h + b1_ref[...], 0.0).astype(compute_dtype)
    # Layer 2.
    h = jnp.dot(h, w2_ref[...], preferred_element_type=jnp.float32)
    h = jnp.maximum(h + b2_ref[...], 0.0).astype(compute_dtype)
    # Output layer (no activation, matching the PyTorch module).
    y = jnp.dot(h, w3_ref[...], preferred_element_type=jnp.float32) + b3_ref[...]
    o_ref[...] = y.astype(o_ref.dtype)   # lane-dense f32 store (out_p % 128 == 0)


def mlp_forward(x, w1, b1, w2, b2, w3, b3, *, batch_tile=None,
                compute_dtype=jnp.bfloat16):
    """x: (B, in_dim) f32.  wK: (inK, outK), bK: (1, outK).  Returns (B, out_dim) f32."""
    B, in_dim = x.shape
    h1 = w1.shape[1]
    h2 = w2.shape[1]
    out_dim = w3.shape[1]
    out_dtype = x.dtype
    bpe_c = jnp.dtype(compute_dtype).itemsize
    bpe_x = jnp.dtype(x.dtype).itemsize

    # ---- pad hidden/output dims to lane multiples (zero padding is inert end-to-end).
    # x's feature dim is NOT padded: its block spans the full last dim and w1's
    # contraction dim stays at the true in_dim.
    h1_p = _round_up(h1, LANE)
    h2_p = _round_up(h2, LANE)
    out_p = _round_up(out_dim, LANE)

    vmem_cap, num_tc = _tpu_generation()
    vmem_ceiling = int(0.75 * vmem_cap)   # ~48 MiB on v7x, ~96 MiB on v5e/v6e

    # Per-step VMEM footprint (weights counted double-buffered = worst case, so the
    # estimate is safe even on the double-buffered fallback path).
    w_elems = in_dim * h1_p + h1_p * h2_p + h2_p * out_p
    b_elems = h1_p + h2_p + out_p

    def vmem_bytes(bt):
        return (2 * w_elems * bpe_c + 2 * b_elems * 4          # weights + biases
                + 2 * bt * in_dim * bpe_x                      # double-buffered f32 x tile
                + 2 * bt * out_p * 4                           # double-buffered f32 out tile
                + bt * in_dim * bpe_c                          # in-kernel bf16 copy of x
                + bt * (h1_p + h2_p) * (4 + bpe_c))            # f32 activations + recasts

    # ---- batch tile: as large as VMEM allows; split only when it buys something.
    #  * 1-TC chips (v5e/v6e): single grid step when the whole batch fits the tile.
    #  * multi-TC chips (v7x): at least num_tc steps (one tile per TensorCore) once
    #    B is big enough; more steps only when B exceeds num_tc * MAX_BATCH_TILE.
    if batch_tile is None:
        batch_tile = min(MAX_BATCH_TILE, _round_up(max(B, 1), SUBLANE))
        if num_tc >= 2 and B >= 2 * SUBLANE:
            batch_tile = min(batch_tile,
                             max(SUBLANE, _round_up(pl.cdiv(B, num_tc), SUBLANE)))
    batch_tile = max(SUBLANE, _round_up(batch_tile, SUBLANE))
    while batch_tile > SUBLANE and vmem_bytes(batch_tile) > vmem_ceiling - (4 << 20):
        batch_tile = max(SUBLANE, _round_up(batch_tile // 2, SUBLANE))

    B_p = _round_up(B, batch_tile)
    grid = (B_p // batch_tile,)

    # ---- operands: only the batch dim of x is (possibly) zero-padded; x keeps its
    # dtype (cast happens in-kernel).  Weights/biases are tiny -> one-time pad/cast
    # in the wrapper is cheap.
    x_p = _pad_to(x, (B_p, in_dim))
    w1_p = _pad_to(w1, (in_dim, h1_p)).astype(compute_dtype)
    w2_p = _pad_to(w2, (h1_p, h2_p)).astype(compute_dtype)
    w3_p = _pad_to(w3, (h2_p, out_p)).astype(compute_dtype)
    b1_p = _pad_to(b1, (1, h1_p)).astype(jnp.float32)
    b2_p = _pad_to(b2, (1, h2_p)).astype(jnp.float32)
    b3_p = _pad_to(b3, (1, out_p)).astype(jnp.float32)

    # TODO(synk): if the resident padded weights ever exceed ~20 MiB (break-even is
    # roughly half as large on v7x's 64 MiB VMEM), switch to a hidden-dim-blocked
    # variant (K/N grid axes + f32 VMEM accumulator) instead of keeping all three
    # weight matrices fully resident.

    # ---- advisory cost estimate with true (unpadded) dims.
    flops = 2 * B * (in_dim * h1 + h1 * h2 + h2 * out_dim)
    bytes_accessed = (B * (in_dim + out_dim) * 4
                      + (in_dim * h1 + h1 * h2 + h2 * out_dim) * bpe_c
                      + (h1 + h2 + out_dim) * 4)

    vmem_limit = int(min(vmem_ceiling,
                         max(16 << 20, vmem_bytes(batch_tile) + (8 << 20))))

    kernel = functools.partial(mlp_kernel, compute_dtype=compute_dtype)

    def build_call(single_buffer_weights):
        if single_buffer_weights:
            # Constant-index blocks never change across grid steps: single-buffer them.
            const = lambda shape: pl.BlockSpec(shape, lambda i: (0, 0),
                                               pipeline_mode=pl.Buffered(1))
        else:
            const = lambda shape: pl.BlockSpec(shape, lambda i: (0, 0))
        return pl.pallas_call(
            kernel,
            out_shape=jax.ShapeDtypeStruct((B_p, out_p), out_dtype),
            grid_spec=pltpu.PrefetchScalarGridSpec(
                num_scalar_prefetch=0,
                grid=grid,
                in_specs=[
                    pl.BlockSpec((batch_tile, in_dim), lambda i: (i, 0)),  # x tile
                    const((in_dim, h1_p)),
                    const((1, h1_p)),
                    const((h1_p, h2_p)),
                    const((1, h2_p)),
                    const((h2_p, out_p)),
                    const((1, out_p)),
                ],
                out_specs=pl.BlockSpec((batch_tile, out_p), lambda i: (i, 0)),
            ),
            compiler_params=pltpu.CompilerParams(
                dimension_semantics=("parallel",),   # batch axis shards across TCs (v7x)
                vmem_limit_bytes=vmem_limit,
            ),
            cost_estimate=pl.CostEstimate(
                flops=flops, transcendentals=0, bytes_accessed=bytes_accessed),
        )

    args = (x_p, w1_p, b1_p, w2_p, b2_p, w3_p, b3_p)
    try:
        out_padded = build_call(True)(*args)
    except Exception:
        # pipeline_mode=pl.Buffered(1) unsupported by this jax/libtpu combination:
        # fall back to default double-buffering (identical semantics).
        out_padded = build_call(False)(*args)

    # Slice away batch / output-lane padding.
    return out_padded[:B, :out_dim]


def init_linear(key, fan_in, fan_out, dtype=jnp.float32):
    """Mimics torch.nn.Linear init: uniform(-1/sqrt(fan_in), 1/sqrt(fan_in)).
    Returns W already transposed to (fan_in, fan_out) for x @ W, and b as (1, fan_out)."""
    kw, kb = jax.random.split(key)
    bound = 1.0 / jnp.sqrt(jnp.asarray(fan_in, dtype))
    w = jax.random.uniform(kw, (fan_in, fan_out), dtype, minval=-bound, maxval=bound)
    b = jax.random.uniform(kb, (1, fan_out), dtype, minval=-bound, maxval=bound)
    return w, b


if __name__ == "__main__":
    # Shapes consistent with the module: inDim=32, hiddenDims=[64, 32], outDim=16.
    B, in_dim, h1, h2, out_dim = 64, 32, 64, 32, 16

    key = jax.random.PRNGKey(0)
    kx, k1, k2, k3 = jax.random.split(key, 4)

    x = jax.random.normal(kx, (B, in_dim), jnp.float32)
    w1, b1 = init_linear(k1, in_dim, h1)
    w2, b2 = init_linear(k2, h1, h2)
    w3, b3 = init_linear(k3, h2, out_dim)

    out = mlp_forward(x, w1, b1, w2, b2, w3, b3)
    out = jax.block_until_ready(out)

    # Pure-JAX f32 reference (kernel uses bf16 operands with f32 accumulation, so
    # the tolerance is relaxed accordingly).
    ref = jnp.maximum(x @ w1 + b1, 0.0)
    ref = jnp.maximum(ref @ w2 + b2, 0.0)
    ref = ref @ w3 + b3

    assert out.shape == (B, out_dim)
    assert jnp.allclose(out, ref, atol=2e-2, rtol=2e-2), (
        float(jnp.max(jnp.abs(out - ref)))
    )

    print("KERNEL_OK")
</pallas_src>

<mosaic_0001>
module attributes {stable_mosaic.version = 11 : i64} {
  func.func @mlp_kernel(%arg0: i32, %arg1: memref<64x32xf32, #tpu.memory_space<vmem>>, %arg2: memref<32x128xbf16, #tpu.memory_space<vmem>>, %arg3: memref<1x128xf32, #tpu.memory_space<vmem>>, %arg4: memref<128x128xbf16, #tpu.memory_space<vmem>>, %arg5: memref<1x128xf32, #tpu.memory_space<vmem>>, %arg6: memref<128x128xbf16, #tpu.memory_space<vmem>>, %arg7: memref<1x128xf32, #tpu.memory_space<vmem>>, %arg8: memref<64x128xf32, #tpu.memory_space<vmem>>) attributes {dimension_semantics = [#tpu.dimension_semantics<parallel>], iteration_bounds = array<i64: 1>, scalar_prefetch = 0 : i64, scratch_operands = 0 : i64, tpu.core_type = #tpu.core_type<tc>, window_params = [{transform_indices = @transform_0, window_bounds = array<i64: 64, 32>}, {pipeline_mode = #tpu.pipeline_mode<synchronous>, transform_indices = @transform_1, window_bounds = array<i64: 32, 128>}, {pipeline_mode = #tpu.pipeline_mode<synchronous>, transform_indices = @transform_2, window_bounds = array<i64: 1, 128>}, {pipeline_mode = #tpu.pipeline_mode<synchronous>, transform_indices = @transform_3, window_bounds = array<i64: 128, 128>}, {pipeline_mode = #tpu.pipeline_mode<synchronous>, transform_indices = @transform_4, window_bounds = array<i64: 1, 128>}, {pipeline_mode = #tpu.pipeline_mode<synchronous>, transform_indices = @transform_5, window_bounds = array<i64: 128, 128>}, {pipeline_mode = #tpu.pipeline_mode<synchronous>, transform_indices = @transform_6, window_bounds = array<i64: 1, 128>}, {transform_indices = @transform_7, window_bounds = array<i64: 64, 128>}]} {
    %c0 = arith.constant 0 : index
    %c0_0 = arith.constant 0 : index
    %0 = vector.load %arg1[%c0, %c0_0] : memref<64x32xf32, #tpu.memory_space<vmem>>, vector<64x32xf32>
    %1 = arith.truncf %0 : vector<64x32xf32> to vector<64x32xbf16>
    %c0_1 = arith.constant 0 : index
    %c0_2 = arith.constant 0 : index
    %2 = vector.load %arg2[%c0_1, %c0_2] : memref<32x128xbf16, #tpu.memory_space<vmem>>, vector<32x128xbf16>
    %cst = arith.constant dense<0.000000e+00> : vector<64x128xf32>
    %3 = tpu.matmul %1, %2, %cst {dimension_numbers = #tpu.dot_dimension_numbers<[1], [0], [0], [1], [0, 0, 1, 1], [], []>} : vector<64x32xbf16>, vector<32x128xbf16>, vector<64x128xf32> -> vector<64x128xf32>
    %c0_3 = arith.constant 0 : index
    %c0_4 = arith.constant 0 : index
    %4 = vector.load %arg3[%c0_3, %c0_4] : memref<1x128xf32, #tpu.memory_space<vmem>>, vector<1x128xf32>
    %5 = vector.broadcast %4 : vector<1x128xf32> to vector<64x128xf32>
    %6 = arith.addf %3, %5 : vector<64x128xf32>
    %cst_5 = arith.constant 0.000000e+00 : f32
    %7 = vector.broadcast %cst_5 : f32 to vector<64x128xf32>
    %8 = arith.maximumf %6, %7 : vector<64x128xf32>
    %9 = arith.truncf %8 : vector<64x128xf32> to vector<64x128xbf16>
    %c0_6 = arith.constant 0 : index
    %c0_7 = arith.constant 0 : index
    %10 = vector.load %arg4[%c0_6, %c0_7] : memref<128x128xbf16, #tpu.memory_space<vmem>>, vector<128x128xbf16>
    %cst_8 = arith.constant dense<0.000000e+00> : vector<64x128xf32>
    %11 = tpu.matmul %9, %10, %cst_8 {dimension_numbers = #tpu.dot_dimension_numbers<[1], [0], [0], [1], [0, 0, 1, 1], [], []>} : vector<64x128xbf16>, vector<128x128xbf16>, vector<64x128xf32> -> vector<64x128xf32>
    %c0_9 = arith.constant 0 : index
    %c0_10 = arith.constant 0 : index
    %12 = vector.load %arg5[%c0_9, %c0_10] : memref<1x128xf32, #tpu.memory_space<vmem>>, vector<1x128xf32>
    %13 = vector.broadcast %12 : vector<1x128xf32> to vector<64x128xf32>
    %14 = arith.addf %11, %13 : vector<64x128xf32>
    %cst_11 = arith.constant 0.000000e+00 : f32
    %15 = vector.broadcast %cst_11 : f32 to vector<64x128xf32>
    %16 = arith.maximumf %14, %15 : vector<64x128xf32>
    %17 = arith.truncf %16 : vector<64x128xf32> to vector<64x128xbf16>
    %c0_12 = arith.constant 0 : index
    %c0_13 = arith.constant 0 : index
    %18 = vector.load %arg6[%c0_12, %c0_13] : memref<128x128xbf16, #tpu.memory_space<vmem>>, vector<128x128xbf16>
    %cst_14 = arith.constant dense<0.000000e+00> : vector<64x128xf32>
    %19 = tpu.matmul %17, %18, %cst_14 {dimension_numbers = #tpu.dot_dimension_numbers<[1], [0], [0], [1], [0, 0, 1, 1], [], []>} : vector<64x128xbf16>, vector<128x128xbf16>, vector<64x128xf32> -> vector<64x128xf32>
    %c0_15 = arith.constant 0 : index
    %c0_16 = arith.constant 0 : index
    %20 = vector.load %arg7[%c0_15, %c0_16] : memref<1x128xf32, #tpu.memory_space<vmem>>, vector<1x128xf32>
    %21 = vector.broadcast %20 : vector<1x128xf32> to vector<64x128xf32>
    %22 = arith.addf %19, %21 : vector<64x128xf32>
    %c0_17 = arith.constant 0 : index
    %c0_18 = arith.constant 0 : index
    %23 = vector.load %arg8[%c0_17, %c0_18] : memref<64x128xf32, #tpu.memory_space<vmem>>, vector<64x128xf32>
    tpu.vector_store %arg8[%c0_17, %c0_18], %22 {strides = array<i32>} : memref<64x128xf32, #tpu.memory_space<vmem>>, vector<64x128xf32>,
    return
  }
  func.func @transform_0(%arg0: i32) -> (i32, i32) {
    %c0_i32 = arith.constant 0 : i32
    %c0_i32_0 = arith.constant 0 : i32
    return %arg0, %c0_i32 : i32, i32
  }
  func.func @transform_1(%arg0: i32) -> (i32, i32) {
    %c0_i32 = arith.constant 0 : i32
    %c0_i32_0 = arith.constant 0 : i32
    %c0_i32_1 = arith.constant 0 : i32
    return %c0_i32, %c0_i32_0 : i32, i32
  }
  func.func @transform_2(%arg0: i32) -> (i32, i32) {
    %c0_i32 = arith.constant 0 : i32
    %c0_i32_0 = arith.constant 0 : i32
    %c0_i32_1 = arith.constant 0 : i32
    return %c0_i32, %c0_i32_0 : i32, i32
  }
  func.func @transform_3(%arg0: i32) -> (i32, i32) {
    %c0_i32 = arith.constant 0 : i32
    %c0_i32_0 = arith.constant 0 : i32
    %c0_i32_1 = arith.constant 0 : i32
    return %c0_i32, %c0_i32_0 : i32, i32
  }
  func.func @transform_4(%arg0: i32) -> (i32, i32) {
    %c0_i32 = arith.constant 0 : i32
    %c0_i32_0 = arith.constant 0 : i32
    %c0_i32_1 = arith.constant 0 : i32
    return %c0_i32, %c0_i32_0 : i32, i32
  }
  func.func @transform_5(%arg0: i32) -> (i32, i32) {
    %c0_i32 = arith.constant 0 : i32
    %c0_i32_0 = arith.constant 0 : i32
    %c0_i32_1 = arith.constant 0 : i32
    return %c0_i32, %c0_i32_0 : i32, i32
  }
  func.func @transform_6(%arg0: i32) -> (i32, i32) {
    %c0_i32 = arith.constant 0 : i32
    %c0_i32_0 = arith.constant 0 : i32
    %c0_i32_1 = arith.constant 0 : i32
    return %c0_i32, %c0_i32_0 : i32, i32
  }
  func.func @transform_7(%arg0: i32) -> (i32, i32) {
    %c0_i32 = arith.constant 0 : i32
    %c0_i32_0 = arith.constant 0 : i32
    return %arg0, %c0_i32 : i32, i32
  }
}

module attributes {stable_mosaic.version = 11 : i64} {
  func.func @mlp_kernel(%arg0: i32, %arg1: memref<64x32xf32, #tpu.memory_space<vmem>>, %arg2: memref<32x128xbf16, #tpu.memory_space<vmem>>, %arg3: memref<1x128xf32, #tpu.memory_space<vmem>>, %arg4: memref<128x128xbf16, #tpu.memory_space<vmem>>, %arg5: memref<1x128xf32, #tpu.memory_space<vmem>>, %arg6: memref<128x128xbf16, #tpu.memory_space<vmem>>, %arg7: memref<1x128xf32, #tpu.memory_space<vmem>>, %arg8: memref<64x128xf32, #tpu.memory_space<vmem>>) attributes {dimension_semantics = [#tpu.dimension_semantics<parallel>], iteration_bounds = array<i64: 1>, scalar_prefetch = 0 : i64, scratch_operands = 0 : i64, tpu.core_type = #tpu.core_type<tc>, window_params = [{transform_indices = @transform_0, window_bounds = array<i64: 64, 32>}, {pipeline_mode = #tpu.pipeline_mode<synchronous>, transform_indices = @transform_1, window_bounds = array<i64: 32, 128>}, {pipeline_mode = #tpu.pipeline_mode<synchronous>, transform_indices = @transform_2, window_bounds = array<i64: 1, 128>}, {pipeline_mode = #tpu.pipeline_mode<synchronous>, transform_indices = @transform_3, window_bounds = array<i64: 128, 128>}, {pipeline_mode = #tpu.pipeline_mode<synchronous>, transform_indices = @transform_4, window_bounds = array<i64: 1, 128>}, {pipeline_mode = #tpu.pipeline_mode<synchronous>, transform_indices = @transform_5, window_bounds = array<i64: 128, 128>}, {pipeline_mode = #tpu.pipeline_mode<synchronous>, transform_indices = @transform_6, window_bounds = array<i64: 1, 128>}, {transform_indices = @transform_7, window_bounds = array<i64: 64, 128>}]} {
    %c0 = arith.constant 0 : index
    %c0_0 = arith.constant 0 : index
    %0 = vector.load %arg1[%c0, %c0_0] : memref<64x32xf32, #tpu.memory_space<vmem>>, vector<64x32xf32>
    %1 = arith.truncf %0 : vector<64x32xf32> to vector<64x32xbf16>
    %c0_1 = arith.constant 0 : index
    %c0_2 = arith.constant 0 : index
    %2 = vector.load %arg2[%c0_1, %c0_2] : memref<32x128xbf16, #tpu.memory_space<vmem>>, vector<32x128xbf16>
    %cst = arith.constant dense<0.000000e+00> : vector<64x128xf32>
    %3 = tpu.matmul %1, %2, %cst {dimension_numbers = #tpu.dot_dimension_numbers<[1], [0], [0], [1], [0, 0, 1, 1], [], []>} : vector<64x32xbf16>, vector<32x128xbf16>, vector<64x128xf32> -> vector<64x128xf32>
    %c0_3 = arith.constant 0 : index
    %c0_4 = arith.constant 0 : index
    %4 = vector.load %arg3[%c0_3, %c0_4] : memref<1x128xf32, #tpu.memory_space<vmem>>, vector<1x128xf32>
    %5 = vector.broadcast %4 : vector<1x128xf32> to vector<64x128xf32>
    %6 = arith.addf %3, %5 : vector<64x128xf32>
    %cst_5 = arith.constant 0.000000e+00 : f32
    %7 = vector.broadcast %cst_5 : f32 to vector<64x128xf32>
    %8 = arith.maximumf %6, %7 : vector<64x128xf32>
    %9 = arith.truncf %8 : vector<64x128xf32> to vector<64x128xbf16>
    %c0_6 = arith.constant 0 : index
    %c0_7 = arith.constant 0 : index
    %10 = vector.load %arg4[%c0_6, %c0_7] : memref<128x128xbf16, #tpu.memory_space<vmem>>, vector<128x128xbf16>
    %cst_8 = arith.constant dense<0.000000e+00> : vector<64x128xf32>
    %11 = tpu.matmul %9, %10, %cst_8 {dimension_numbers = #tpu.dot_dimension_numbers<[1], [0], [0], [1], [0, 0, 1, 1], [], []>} : vector<64x128xbf16>, vector<128x128xbf16>, vector<64x128xf32> -> vector<64x128xf32>
    %c0_9 = arith.constant 0 : index
    %c0_10 = arith.constant 0 : index
    %12 = vector.load %arg5[%c0_9, %c0_10] : memref<1x128xf32, #tpu.memory_space<vmem>>, vector<1x128xf32>
    %13 = vector.broadcast %12 : vector<1x128xf32> to vector<64x128xf32>
    %14 = arith.addf %11, %13 : vector<64x128xf32>
    %cst_11 = arith.constant 0.000000e+00 : f32
    %15 = vector.broadcast %cst_11 : f32 to vector<64x128xf32>
    %16 = arith.maximumf %14, %15 : vector<64x128xf32>
    %17 = arith.truncf %16 : vector<64x128xf32> to vector<64x128xbf16>
    %c0_12 = arith.constant 0 : index
    %c0_13 = arith.constant 0 : index
    %18 = vector.load %arg6[%c0_12, %c0_13] : memref<128x128xbf16, #tpu.memory_space<vmem>>, vector<128x128xbf16>
    %cst_14 = arith.constant dense<0.000000e+00> : vector<64x128xf32>
    %19 = tpu.matmul %17, %18, %cst_14 {dimension_numbers = #tpu.dot_dimension_numbers<[1], [0], [0], [1], [0, 0, 1, 1], [], []>} : vector<64x128xbf16>, vector<128x128xbf16>, vector<64x128xf32> -> vector<64x128xf32>
    %c0_15 = arith.constant 0 : index
    %c0_16 = arith.constant 0 : index
    %20 = vector.load %arg7[%c0_15, %c0_16] : memref<1x128xf32, #tpu.memory_space<vmem>>, vector<1x128xf32>
    %21 = vector.broadcast %20 : vector<1x128xf32> to vector<64x128xf32>
    %22 = arith.addf %19, %21 : vector<64x128xf32>
    %c0_17 = arith.constant 0 : index
    %c0_18 = arith.constant 0 : index
    %23 = vector.load %arg8[%c0_17, %c0_18] : memref<64x128xf32, #tpu.memory_space<vmem>>, vector<64x128xf32>
    tpu.vector_store %arg8[%c0_17, %c0_18], %22 {strides = array<i32>} : memref<64x128xf32, #tpu.memory_space<vmem>>, vector<64x128xf32>,
    return
  }
  func.func @transform_0(%arg0: i32) -> (i32, i32) {
    %c0_i32 = arith.constant 0 : i32
    %c0_i32_0 = arith.constant 0 : i32
    return %arg0, %c0_i32 : i32, i32
  }
  func.func @transform_1(%arg0: i32) -> (i32, i32) {
    %c0_i32 = arith.constant 0 : i32
    %c0_i32_0 = arith.constant 0 : i32
    %c0_i32_1 = arith.constant 0 : i32
    return %c0_i32, %c0_i32_0 : i32, i32
  }
  func.func @transform_2(%arg0: i32) -> (i32, i32) {
    %c0_i32 = arith.constant 0 : i32
    %c0_i32_0 = arith.constant 0 : i32
    %c0_i32_1 = arith.constant 0 : i32
    return %c0_i32, %c0_i32_0 : i32, i32
  }
  func.func @transform_3(%arg0: i32) -> (i32, i32) {
    %c0_i32 = arith.constant 0 : i32
    %c0_i32_0 = arith.constant 0 : i32
    %c0_i32_1 = arith.constant 0 : i32
    return %c0_i32, %c0_i32_0 : i32, i32
  }
  func.func @transform_4(%arg0: i32) -> (i32, i32) {
    %c0_i32 = arith.constant 0 : i32
    %c0_i32_0 = arith.constant 0 : i32
    %c0_i32_1 = arith.constant 0 : i32
    return %c0_i32, %c0_i32_0 : i32, i32
  }
  func.func @transform_5(%arg0: i32) -> (i32, i32) {
    %c0_i32 = arith.constant 0 : i32
    %c0_i32_0 = arith.constant 0 : i32
    %c0_i32_1 = arith.constant 0 : i32
    return %c0_i32, %c0_i32_0 : i32, i32
  }
  func.func @transform_6(%arg0: i32) -> (i32, i32) {
    %c0_i32 = arith.constant 0 : i32
    %c0_i32_0 = arith.constant 0 : i32
    %c0_i32_1 = arith.constant 0 : i32
    return %c0_i32, %c0_i32_0 : i32, i32
  }
  func.func @transform_7(%arg0: i32) -> (i32, i32) {
    %c0_i32 = arith.constant 0 : i32
    %c0_i32_0 = arith.constant 0 : i32
    return %arg0, %c0_i32 : i32, i32
  }
}

</mosaic_0001>

<bundles_post_ra>
// kernel: tpu_custom_call.1
= control target key start
LH: loop header
LB: loop body
LE: loop exit
PB: predicated region body
PF: predicated region fallthrough
CT: control target
= control target key end

     0   :  { %12 = vsyncpa [#allocation3], 0  ;;  %s800_s0 = inlined_call_operand.vmem [shape: f32[64,32], index: 0, kind: input, shape index: {}]   ;;  %s801_s1 = inlined_call_operand.vmem [shape: bf16[32,128], index: 1, kind: input, shape index: {}]   ;;  %s802_s2 = inlined_call_operand.vmem [shape: f32[1,128], index: 2, kind: input, shape index: {}]   ;;  %s803_s3 = inlined_call_operand.vmem [shape: bf16[128,128], index: 3, kind: input, shape index: {}]   ;;  %s804_s4 = inlined_call_operand.vmem [shape: f32[1,128], index: 4, kind: input, shape index: {}]   ;;  %s805_s5 = inlined_call_operand.hbm [shape: bf16[128,128], index: 5, kind: input, shape index: {}]   ;;  %s806_s6 = inlined_call_operand.vmem [shape: f32[1,128], index: 6, kind: input, shape index: {}]   ;;  %s807_s7 = inlined_call_operand.hbm [shape: f32[64,128], index: 7, kind: output, shape index: {}]  }
   0x1   :  { %13 = vsyncpa [#allocation4], 0  ;;  %s663_s24 = smov [#allocation2]   ;;  %s615_s28 = scalar_lea.hbm %s805_s5, 1024 }
   0x2   :  { %s29_s25 = sshll.u32 %s663_s24, 4  ;;  %p616_p0 = scmp.ne.s32.totalorder %s805_s5, %s615_s28  ;;  %s30_s25 = int_to_ptr.vmem [resolvable:$true] %s29_s25 }
   0x3   :  { %p619_p1 = scmp.lt.u32.totalorder %s615_s28, %s805_s5 }
   0x5   :  { %p621_p2 = pnand %p619_p1, %p616_p0 }
   0x7   :  { %624 = shalt.err (!%p621_p2)
}
   0x8   :  { %s625_s10 = scalar_lea.vmem %s30_s25, 1024  ;;  %p630_p4 = scmp.lt.s32.totalorder %s30_s25, %s30_s25 }
   0x9   :  { %p626_p3 = scmp.ne.s32.totalorder %s30_s25, %s625_s10  ;;  %p631_p5 = scmp.lt.s32.totalorder %s625_s10, %s625_s10 }
   0xb   :  { %p632_p6 = por %p631_p5, %p630_p4 }
   0xd   :  { %p633_p7 = pnand %p632_p6, %p626_p3 }
   0xf   :  { %636 = shalt.err (!%p633_p7)
}
  0x10   :  { %s664_s11 = smov 64   ;;  %s665_s12 = smov 4  }
  0x11   :  { %35 = dma.hbm_to_vmem [thread:$0]  %s805_s5, 1024, %s30_s25, [#allocation3], %s664_s11, %s664_s11, %s665_s12  }
  0x12   :  { %659 = dma.done.wait [#allocation3], 1024  }
  0x13   :  { %660 = vsyncadd [#allocation3], 4294966272  ;;  %v597_v0 = vld [vmem:[%s801_s1] sm:$0xff]   ;;  %v598_v1 = vld [vmem:[%s801_s1 + $0x8] sm:$0xff]   ;;  %vm77_vm0 = vcmask 261120   ;;  %s666_s26 = smov [#allocation5]  }
  0x14   :  { %531 = vmatprep.subr.bf16.mxu0 %v597_v0  ;;  %v42_v2 = vld [vmem:[%s800_s0] sm:$0xff]  ;;  %v43_v3 = vld [vmem:[%s800_s0 + $0x8] sm:$0xff]  ;;  %v44_v5 = vld [vmem:[%s800_s0 + $0x10] sm:$0xff]  ;;  %s464_s27 = sshll.u32 %s666_s26, 4  ;;  %s465_s27 = int_to_ptr.vmem [resolvable:$true] %s464_s27 }
  0x15   :  { %532 = vmatpush3.bf16.msra.mxu0 %v597_v0  ;;  %v50_v4 = vpack.c.bf16 %v43_v3, %v42_v2  ;;  %v45_v6 = vld [vmem:[%s800_s0 + $0x18] sm:$0xff]  ;;  %v46_v7 = vld [vmem:[%s800_s0 + $0x20] sm:$0xff]  ;;  %v47_v8 = vld [vmem:[%s800_s0 + $0x28] sm:$0xff]  ;;  %p642_p9 = scmp.lt.s32.totalorder %s465_s27, %s465_s27 }
  0x16   :  { %533 = vmatprep.subr.bf16.mxu0 %v598_v1  ;;  %v599_v9 = vld [vmem:[%s803_s3] sm:$0xff]   ;;  %v51_v10 = vpack.c.bf16 %v45_v6, %v44_v5  ;;  %v600_v11 = vld [vmem:[%s803_s3 + $0x8] sm:$0xff]   ;;  %v52_v12 = vpack.c.bf16 %v47_v8, %v46_v7  ;;  %v48_v13 = vld [vmem:[%s800_s0 + $0x30] sm:$0xff] }
  0x17   :  { %535 = vmatprep.mubr.msk.bf16.mxu0 %vm77_vm0, %v50_v4  ;;  %543 = vmatprep.subr.bf16.mxu1 %v599_v9  ;;  %v601_v14 = vld [vmem:[%s803_s3 + $0x10] sm:$0xff]   ;;  %v49_v15 = vld [vmem:[%s800_s0 + $0x38] sm:$0xff]  ;;  %v603_v18 = vld [vmem:[%s803_s3 + $0x20] sm:$0xff]  }
  0x18   :  { %544 = vmatpush3.bf16.msra.mxu1 %v599_v9  ;;  %v602_v16 = vld [vmem:[%s803_s3 + $0x18] sm:$0xff]   ;;  %v53_v17 = vpack.c.bf16 %v49_v15, %v48_v13  ;;  %v604_v19 = vld [vmem:[%s803_s3 + $0x28] sm:$0xff]   ;;  %v605_v20 = vld [vmem:[%s803_s3 + $0x30] sm:$0xff]  }
  0x19   :  { %534 = vmatpush3.bf16.msra.mxu0 %v598_v1  ;;  %545 = vmatprep.subr.bf16.mxu1 %v600_v11  ;;  %v606_v21 = vld [vmem:[%s803_s3 + $0x38] sm:$0xff]   ;;  %v607_v22 = vld [vmem:[#allocation2] sm:$0xff]   ;;  %v608_v23 = vld [vmem:[#allocation2 + $0x8] sm:$0xff]  }
  0x1a   :  { %567 = vmatprep.subr.bf16.mxu0 %v607_v22  ;;  %v609_v24 = vld [vmem:[#allocation2 + $0x10] sm:$0xff]   ;;  %v610_v25 = vld [vmem:[#allocation2 + $0x18] sm:$0xff]   ;;  %v611_v26 = vld [vmem:[#allocation2 + $0x20] sm:$0xff]  }
  0x1b   :  { %v612_v27 = vld [vmem:[#allocation2 + $0x28] sm:$0xff]   ;;  %v476_v28 = vld [vmem:[%s802_s2] ss:$0 sm:$0xff]  ;;  %v613_v57 = vld [vmem:[#allocation2 + $0x30] sm:$0xff]  }
  0x1c   :  { %536 = vmatmul.mubr.msk.bf16.vlgmr.msra.gmra.mrb[0].mxu0 %vm77_vm0, %v51_v10  ;;  %546 = vmatpush3.bf16.msra.mxu1 %v600_v11  ;;  %v614_v58 = vld [vmem:[#allocation2 + $0x38] sm:$0xff]   ;;  %v483_v59 = vld [vmem:[%s804_s4] ss:$0 sm:$0xff] }
  0x1d   :  { %539 = vmatprep.mubr.msk.bf16.mxu0 %vm77_vm0, %v52_v12  ;;  %547 = vmatprep.subr.bf16.mxu1 %v601_v14 }
  0x1e   :  { %568 = vmatpush3.bf16.msra.mxu0 %v607_v22 }
  0x1f   :  { %569 = vmatprep.subr.bf16.mxu0 %v608_v23 }
  0x20   :  { %548 = vmatpush3.bf16.msra.mxu1 %v601_v14 }
  0x21   :  { %549 = vmatprep.subr.bf16.mxu1 %v602_v16 }
  0x22   :  { %570 = vmatpush3.bf16.msra.mxu0 %v608_v23 }
  0x23   :  { %571 = vmatprep.subr.bf16.mxu0 %v609_v24 }
  0x24   :  { %540 = vmatmul.mubr.msk.bf16.gmra.mrb[4].mxu0 %vm77_vm0, %v53_v17  ;;  %550 = vmatpush3.bf16.msra.mxu1 %v602_v16 }
  0x25   :  { %551 = vmatprep.subr.bf16.mxu1 %v603_v18 }
  0x26   :  { %572 = vmatpush3.bf16.msra.mxu0 %v609_v24  ;;  %v492_v24 = vld [vmem:[%s806_s6] ss:$0 sm:$0xff]  ;;  %s637_s6 = scalar_lea.vmem %s465_s27, 1024 }
  0x27   :  { %573 = vmatprep.subr.bf16.mxu0 %v610_v25  ;;  %p638_p8 = scmp.ne.s32.totalorder %s465_s27, %s637_s6  ;;  %p643_p10 = scmp.lt.s32.totalorder %s637_s6, %s637_s6 }
  0x28   :  { %552 = vmatpush3.bf16.msra.mxu1 %v603_v18 }
  0x29   :  { %553 = vmatprep.subr.bf16.mxu1 %v604_v19  ;;  %p644_p11 = por %p643_p10, %p642_p9 }
  0x2a   :  { %574 = vmatpush3.bf16.msra.mxu0 %v610_v25 }
  0x2b   :  { %575 = vmatprep.subr.bf16.mxu0 %v611_v26  ;;  %p645_p12 = pnand %p644_p11, %p638_p8 }
  0x2c   :  { %554 = vmatpush3.bf16.msra.mxu1 %v604_v19 }
  0x2d   :  { %555 = vmatprep.subr.bf16.mxu1 %v605_v20 }
  0x2e   :  { %576 = vmatpush3.bf16.msra.mxu0 %v611_v26 }
  0x2f   :  { %577 = vmatprep.subr.bf16.mxu0 %v612_v27 }
  0x30   :  { %556 = vmatpush3.bf16.msra.mxu1 %v605_v20 }
  0x31   :  { %557 = vmatprep.subr.bf16.mxu1 %v606_v21 }
  0x32   :  { %578 = vmatpush3.bf16.msra.mxu0 %v612_v27 }
  0x33   :  { %579 = vmatprep.subr.bf16.mxu0 %v613_v57 }
  0x34   :  { %558 = vmatpush3.bf16.msra.mxu1 %v606_v21 }
  0x36   :  { %580 = vmatpush3.bf16.msra.mxu0 %v613_v57 }
  0x37   :  { %581 = vmatprep.subr.bf16.mxu0 %v614_v58 }
  0x3a   :  { %582 = vmatpush3.bf16.msra.mxu0 %v614_v58 }
  0xef   :  { %v537_v29 = vpop.f32.mrb[0].mxu0 }
  0xf0   :  { %v133_v30 = vadd.f32 %v537_v29, %v476_v28  ;;  %v124_v31 = vpop.f32.mrb[1].mxu0 }
  0xf1   :  { %v125_v32 = vadd.f32 %v476_v28, %v124_v31  ;;  %v538_v33 = vpop.f32.mrb[2].mxu0 }
  0xf2   :  { %v136_v34 = vadd.f32 %v538_v33, %v476_v28  ;;  %v127_v35 = vpop.f32.mrb[3].mxu0  ;;  %v157_v37 = vmax.f32 %v133_v30, 0.0 }
  0xf3   :  { %v128_v36 = vadd.f32 %v476_v28, %v127_v35  ;;  %v155_v39 = vmax.f32 %v125_v32, 0.0 }
  0xf4   :  { %v158_v38 = vmax.f32 %v136_v34, 0.0 }
  0xf5   :  { %v156_v40 = vmax.f32 %v128_v36, 0.0 }
  0xf6   :  { %v164_v41 = vpack.c.bf16 %v158_v38, %v157_v37 }
  0xf7   :  { %v541_v42 = vpop.f32.mrb[4].mxu0  ;;  %v163_v43 = vpack.c.bf16 %v156_v40, %v155_v39 }
  0xf8   :  { %v149_v44 = vadd.f32 %v541_v42, %v476_v28  ;;  %v140_v45 = vpop.f32.mrb[5].mxu0 }
  0xf9   :  { %v141_v46 = vadd.f32 %v476_v28, %v140_v45  ;;  %v542_v47 = vpop.f32.mrb[6].mxu0  ;;  %559 = vmatprep.mubr.bf16.mxu1 %v163_v43 }
  0xfa   :  { %v152_v48 = vadd.f32 %v542_v47, %v476_v28  ;;  %v143_v49 = vpop.f32.mrb[7].mxu0  ;;  %560 = vmatmul.mubr.bf16.vlgmr.msra.gmra.mrb[0].mxu1 %v164_v41  ;;  %v161_v51 = vmax.f32 %v149_v44, 0.0 }
  0xfb   :  { %v144_v50 = vadd.f32 %v476_v28, %v143_v49  ;;  %v159_v53 = vmax.f32 %v141_v46, 0.0 }
  0xfc   :  { %v162_v52 = vmax.f32 %v152_v48, 0.0 }
  0xfd   :  { %v160_v54 = vmax.f32 %v144_v50, 0.0 }
  0xfe   :  { %v166_v55 = vpack.c.bf16 %v162_v52, %v161_v51 }
  0xff   :  { %v165_v56 = vpack.c.bf16 %v160_v54, %v159_v53 }
 0x101   :  { %563 = vmatprep.mubr.bf16.mxu1 %v165_v56 }
 0x102   :  { %564 = vmatmul.mubr.bf16.gmra.mrb[4].mxu1 %v166_v55 }
 0x1cd   :  { %v561_v60 = vpop.f32.mrb[0].mxu1 }
 0x1ce   :  { %v281_v61 = vadd.f32 %v561_v60, %v483_v59  ;;  %v272_v62 = vpop.f32.mrb[1].mxu1 }
 0x1cf   :  { %v273_v63 = vadd.f32 %v483_v59, %v272_v62  ;;  %v562_v0 = vpop.f32.mrb[2].mxu1 }
 0x1d0   :  { %v284_v1 = vadd.f32 %v562_v0, %v483_v59  ;;  %v275_v2 = vpop.f32.mrb[3].mxu1  ;;  %v305_v4 = vmax.f32 %v281_v61, 0.0 }
 0x1d1   :  { %v276_v3 = vadd.f32 %v483_v59, %v275_v2  ;;  %v303_v6 = vmax.f32 %v273_v63, 0.0 }
 0x1d2   :  { %v306_v5 = vmax.f32 %v284_v1, 0.0 }
 0x1d3   :  { %v304_v7 = vmax.f32 %v276_v3, 0.0 }
 0x1d4   :  { %v312_v8 = vpack.c.bf16 %v306_v5, %v305_v4 }
 0x1d5   :  { %v311_v9 = vpack.c.bf16 %v304_v7, %v303_v6  ;;  %v565_v10 = vpop.f32.mrb[4].mxu1 }
 0x1d6   :  { %v297_v11 = vadd.f32 %v565_v10, %v483_v59  ;;  %v288_v12 = vpop.f32.mrb[5].mxu1 }
 0x1d7   :  { %v289_v13 = vadd.f32 %v483_v59, %v288_v12  ;;  %v566_v14 = vpop.f32.mrb[6].mxu1  ;;  %583 = vmatprep.mubr.bf16.mxu0 %v311_v9 }
 0x1d8   :  { %v300_v15 = vadd.f32 %v566_v14, %v483_v59  ;;  %v291_v16 = vpop.f32.mrb[7].mxu1  ;;  %584 = vmatmul.mubr.bf16.vlgmr.msra.gmra.mrb[8].mxu0 %v312_v8  ;;  %v309_v18 = vmax.f32 %v297_v11, 0.0 }
 0x1d9   :  { %v292_v17 = vadd.f32 %v483_v59, %v291_v16  ;;  %v307_v20 = vmax.f32 %v289_v13, 0.0 }
 0x1da   :  { %v310_v19 = vmax.f32 %v300_v15, 0.0 }
 0x1db   :  { %v308_v21 = vmax.f32 %v292_v17, 0.0 }
 0x1dc   :  { %v314_v22 = vpack.c.bf16 %v310_v19, %v309_v18 }
 0x1dd   :  { %v313_v23 = vpack.c.bf16 %v308_v21, %v307_v20 }
 0x1df   :  { %587 = vmatprep.mubr.bf16.mxu0 %v313_v23 }
 0x1e0   :  { %588 = vmatmul.mubr.bf16.gmra.mrb[12].mxu0 %v314_v22 }
 0x2ab   :  { %v585_v25 = vpop.f32.mrb[8].mxu0 }
 0x2ac   :  { %v429_v26 = vadd.f32 %v585_v25, %v492_v24  ;;  %v420_v27 = vpop.f32.mrb[9].mxu0 }
 0x2ad   :  { %v421_v28 = vadd.f32 %v492_v24, %v420_v27  ;;  %v586_v29 = vpop.f32.mrb[10].mxu0 }
 0x2ae   :  { %453 = vst [vmem:[#allocation5 + $0x10] sm:$0xff] %v429_v26  ;;  %v432_v30 = vadd.f32 %v586_v29, %v492_v24  ;;  %v423_v31 = vpop.f32.mrb[11].mxu0 }
 0x2af   :  { %451 = vst [vmem:[#allocation5] sm:$0xff] %v421_v28  ;;  %v424_v32 = vadd.f32 %v492_v24, %v423_v31 }
 0x2b0   :  { %454 = vst [vmem:[#allocation5 + $0x18] sm:$0xff] %v432_v30 }
 0x2b1   :  { %452 = vst [vmem:[#allocation5 + $0x8] sm:$0xff] %v424_v32 }
 0x2b3   :  { %v589_v33 = vpop.f32.mrb[12].mxu0 }
 0x2b4   :  { %v445_v34 = vadd.f32 %v589_v33, %v492_v24  ;;  %v436_v35 = vpop.f32.mrb[13].mxu0 }
 0x2b5   :  { %v437_v36 = vadd.f32 %v492_v24, %v436_v35  ;;  %v590_v37 = vpop.f32.mrb[14].mxu0 }
 0x2b6   :  { %457 = vst [vmem:[#allocation5 + $0x30] sm:$0xff] %v445_v34  ;;  %v448_v38 = vadd.f32 %v590_v37, %v492_v24  ;;  %v439_v39 = vpop.f32.mrb[15].mxu0 }
 0x2b7   :  { %455 = vst [vmem:[#allocation5 + $0x20] sm:$0xff] %v437_v36  ;;  %v440_v40 = vadd.f32 %v492_v24, %v439_v39 }
 0x2b8   :  { %458 = vst [vmem:[#allocation5 + $0x38] sm:$0xff] %v448_v38 }
 0x2b9   :  { %456 = vst [vmem:[#allocation5 + $0x28] sm:$0xff] %v440_v40 }
 0x2ba   :  { %648 = shalt.err (!%p645_p12)
}
 0x2bb   :  { %s649_s30 = scalar_lea.hbm %s807_s7, 1024 }
 0x2bc   :  { %p650_p13 = scmp.ne.s32.totalorder %s807_s7, %s649_s30  ;;  %p653_p0 = scmp.lt.u32.totalorder %s649_s30, %s807_s7 }
 0x2be   :  { %p655_p1 = pnand %p653_p0, %p650_p13 }
 0x2c0   :  { %658 = shalt.err (!%p655_p1)
}
 0x2c1   :  { %s667_s12 = smov 128   ;;  %s668_s13 = smov 8  }
 0x2c2   :  { %470 = dma.vmem_to_hbm [thread:$0]  %s465_s27, 1024, %s807_s7, [#allocation4], %s667_s12, %s667_s12, %s668_s13  }
 0x2c3   :  { %661 = dma.done.wait [#allocation4], 1024  }
 0x2c4   :  { %662 = vsyncadd [#allocation4], 4294966272 }
 0x2c5   :  { %474 = vsyncpa [#allocation3], 1 }
 0x2c6   :  { %475 = vsyncpa [#allocation4], 1 }

// kernel: tpu_custom_call.1
= control target key start
LH: loop header
LB: loop body
LE: loop exit
PB: predicated region body
PF: predicated region fallthrough
CT: control target
= control target key end

     0   :  { %12 = vsyncpa [#allocation3], 0  ;;  %s800_s0 = inlined_call_operand.vmem [shape: f32[64,32], index: 0, kind: input, shape index: {}]   ;;  %s801_s1 = inlined_call_operand.vmem [shape: bf16[32,128], index: 1, kind: input, shape index: {}]   ;;  %s802_s2 = inlined_call_operand.vmem [shape: f32[1,128], index: 2, kind: input, shape index: {}]   ;;  %s803_s3 = inlined_call_operand.vmem [shape: bf16[128,128], index: 3, kind: input, shape index: {}]   ;;  %s804_s4 = inlined_call_operand.vmem [shape: f32[1,128], index: 4, kind: input, shape index: {}]   ;;  %s805_s5 = inlined_call_operand.hbm [shape: bf16[128,128], index: 5, kind: input, shape index: {}]   ;;  %s806_s6 = inlined_call_operand.vmem [shape: f32[1,128], index: 6, kind: input, shape index: {}]   ;;  %s807_s7 = inlined_call_operand.hbm [shape: f32[64,128], index: 7, kind: output, shape index: {}]  }
   0x1   :  { %13 = vsyncpa [#allocation4], 0  ;;  %s663_s24 = smov [#allocation2]   ;;  %s615_s28 = scalar_lea.hbm %s805_s5, 1024 }
   0x2   :  { %s29_s25 = sshll.u32 %s663_s24, 4  ;;  %p616_p0 = scmp.ne.s32.totalorder %s805_s5, %s615_s28  ;;  %s30_s25 = int_to_ptr.vmem [resolvable:$true] %s29_s25 }
   0x3   :  { %p619_p1 = scmp.lt.u32.totalorder %s615_s28, %s805_s5 }
   0x5   :  { %p621_p2 = pnand %p619_p1, %p616_p0 }
   0x7   :  { %624 = shalt.err (!%p621_p2)
}
   0x8   :  { %s625_s10 = scalar_lea.vmem %s30_s25, 1024  ;;  %p630_p4 = scmp.lt.s32.totalorder %s30_s25, %s30_s25 }
   0x9   :  { %p626_p3 = scmp.ne.s32.totalorder %s30_s25, %s625_s10  ;;  %p631_p5 = scmp.lt.s32.totalorder %s625_s10, %s625_s10 }
   0xb   :  { %p632_p6 = por %p631_p5, %p630_p4 }
   0xd   :  { %p633_p7 = pnand %p632_p6, %p626_p3 }
   0xf   :  { %636 = shalt.err (!%p633_p7)
}
  0x10   :  { %s664_s11 = smov 64   ;;  %s665_s12 = smov 4  }
  0x11   :  { %35 = dma.hbm_to_vmem [thread:$0]  %s805_s5, 1024, %s30_s25, [#allocation3], %s664_s11, %s664_s11, %s665_s12  }
  0x12   :  { %659 = dma.done.wait [#allocation3], 1024  }
  0x13   :  { %660 = vsyncadd [#allocation3], 4294966272  ;;  %v597_v0 = vld [vmem:[%s801_s1] sm:$0xff]   ;;  %v598_v1 = vld [vmem:[%s801_s1 + $0x8] sm:$0xff]   ;;  %vm77_vm0 = vcmask 261120   ;;  %s666_s26 = smov [#allocation5]  }
  0x14   :  { %531 = vmatprep.subr.bf16.mxu0 %v597_v0  ;;  %v42_v2 = vld [vmem:[%s800_s0] sm:$0xff]  ;;  %v43_v3 = vld [vmem:[%s800_s0 + $0x8] sm:$0xff]  ;;  %v44_v5 = vld [vmem:[%s800_s0 + $0x10] sm:$0xff]  ;;  %s464_s27 = sshll.u32 %s666_s26, 4  ;;  %s465_s27 = int_to_ptr.vmem [resolvable:$true] %s464_s27 }
  0x15   :  { %532 = vmatpush3.bf16.msra.mxu0 %v597_v0  ;;  %v50_v4 = vpack.c.bf16 %v43_v3, %v42_v2  ;;  %v45_v6 = vld [vmem:[%s800_s0 + $0x18] sm:$0xff]  ;;  %v46_v7 = vld [vmem:[%s800_s0 + $0x20] sm:$0xff]  ;;  %v47_v8 = vld [vmem:[%s800_s0 + $0x28] sm:$0xff]  ;;  %p642_p9 = scmp.lt.s32.totalorder %s465_s27, %s465_s27 }
  0x16   :  { %533 = vmatprep.subr.bf16.mxu0 %v598_v1  ;;  %v599_v9 = vld [vmem:[%s803_s3] sm:$0xff]   ;;  %v51_v10 = vpack.c.bf16 %v45_v6, %v44_v5  ;;  %v600_v11 = vld [vmem:[%s803_s3 + $0x8] sm:$0xff]   ;;  %v52_v12 = vpack.c.bf16 %v47_v8, %v46_v7  ;;  %v48_v13 = vld [vmem:[%s800_s0 + $0x30] sm:$0xff] }
  0x17   :  { %535 = vmatprep.mubr.msk.bf16.mxu0 %vm77_vm0, %v50_v4  ;;  %543 = vmatprep.subr.bf16.mxu1 %v599_v9  ;;  %v601_v14 = vld [vmem:[%s803_s3 + $0x10] sm:$0xff]   ;;  %v49_v15 = vld [vmem:[%s800_s0 + $0x38] sm:$0xff]  ;;  %v603_v18 = vld [vmem:[%s803_s3 + $0x20] sm:$0xff]  }
  0x18   :  { %544 = vmatpush3.bf16.msra.mxu1 %v599_v9  ;;  %v602_v16 = vld [vmem:[%s803_s3 + $0x18] sm:$0xff]   ;;  %v53_v17 = vpack.c.bf16 %v49_v15, %v48_v13  ;;  %v604_v19 = vld [vmem:[%s803_s3 + $0x28] sm:$0xff]   ;;  %v605_v20 = vld [vmem:[%s803_s3 + $0x30] sm:$0xff]  }
  0x19   :  { %534 = vmatpush3.bf16.msra.mxu0 %v598_v1  ;;  %545 = vmatprep.subr.bf16.mxu1 %v600_v11  ;;  %v606_v21 = vld [vmem:[%s803_s3 + $0x38] sm:$0xff]   ;;  %v607_v22 = vld [vmem:[#allocation2] sm:$0xff]   ;;  %v608_v23 = vld [vmem:[#allocation2 + $0x8] sm:$0xff]  }
  0x1a   :  { %567 = vmatprep.subr.bf16.mxu0 %v607_v22  ;;  %v609_v24 = vld [vmem:[#allocation2 + $0x10] sm:$0xff]   ;;  %v610_v25 = vld [vmem:[#allocation2 + $0x18] sm:$0xff]   ;;  %v611_v26 = vld [vmem:[#allocation2 + $0x20] sm:$0xff]  }
  0x1b   :  { %v612_v27 = vld [vmem:[#allocation2 + $0x28] sm:$0xff]   ;;  %v476_v28 = vld [vmem:[%s802_s2] ss:$0 sm:$0xff]  ;;  %v613_v57 = vld [vmem:[#allocation2 + $0x30] sm:$0xff]  }
  0x1c   :  { %536 = vmatmul.mubr.msk.bf16.vlgmr.msra.gmra.mrb[0].mxu0 %vm77_vm0, %v51_v10  ;;  %546 = vmatpush3.bf16.msra.mxu1 %v600_v11  ;;  %v614_v58 = vld [vmem:[#allocation2 + $0x38] sm:$0xff]   ;;  %v483_v59 = vld [vmem:[%s804_s4] ss:$0 sm:$0xff] }
  0x1d   :  { %539 = vmatprep.mubr.msk.bf16.mxu0 %vm77_vm0, %v52_v12  ;;  %547 = vmatprep.subr.bf16.mxu1 %v601_v14 }
  0x1e   :  { %568 = vmatpush3.bf16.msra.mxu0 %v607_v22 }
  0x1f   :  { %569 = vmatprep.subr.bf16.mxu0 %v608_v23 }
  0x20   :  { %548 = vmatpush3.bf16.msra.mxu1 %v601_v14 }
  0x21   :  { %549 = vmatprep.subr.bf16.mxu1 %v602_v16 }
  0x22   :  { %570 = vmatpush3.bf16.msra.mxu0 %v608_v23 }
  0x23   :  { %571 = vmatprep.subr.bf16.mxu0 %v609_v24 }
  0x24   :  { %540 = vmatmul.mubr.msk.bf16.gmra.mrb[4].mxu0 %vm77_vm0, %v53_v17  ;;  %550 = vmatpush3.bf16.msra.mxu1 %v602_v16 }
  0x25   :  { %551 = vmatprep.subr.bf16.mxu1 %v603_v18 }
  0x26   :  { %572 = vmatpush3.bf16.msra.mxu0 %v609_v24  ;;  %v492_v24 = vld [vmem:[%s806_s6] ss:$0 sm:$0xff]  ;;  %s637_s6 = scalar_lea.vmem %s465_s27, 1024 }
  0x27   :  { %573 = vmatprep.subr.bf16.mxu0 %v610_v25  ;;  %p638_p8 = scmp.ne.s32.totalorder %s465_s27, %s637_s6  ;;  %p643_p10 = scmp.lt.s32.totalorder %s637_s6, %s637_s6 }
  0x28   :  { %552 = vmatpush3.bf16.msra.mxu1 %v603_v18 }
  0x29   :  { %553 = vmatprep.subr.bf16.mxu1 %v604_v19  ;;  %p644_p11 = por %p643_p10, %p642_p9 }
  0x2a   :  { %574 = vmatpush3.bf16.msra.mxu0 %v610_v25 }
  0x2b   :  { %575 = vmatprep.subr.bf16.mxu0 %v611_v26  ;;  %p645_p12 = pnand %p644_p11, %p638_p8 }
  0x2c   :  { %554 = vmatpush3.bf16.msra.mxu1 %v604_v19 }
  0x2d   :  { %555 = vmatprep.subr.bf16.mxu1 %v605_v20 }
  0x2e   :  { %576 = vmatpush3.bf16.msra.mxu0 %v611_v26 }
  0x2f   :  { %577 = vmatprep.subr.bf16.mxu0 %v612_v27 }
  0x30   :  { %556 = vmatpush3.bf16.msra.mxu1 %v605_v20 }
  0x31   :  { %557 = vmatprep.subr.bf16.mxu1 %v606_v21 }
  0x32   :  { %578 = vmatpush3.bf16.msra.mxu0 %v612_v27 }
  0x33   :  { %579 = vmatprep.subr.bf16.mxu0 %v613_v57 }
  0x34   :  { %558 = vmatpush3.bf16.msra.mxu1 %v606_v21 }
  0x36   :  { %580 = vmatpush3.bf16.msra.mxu0 %v613_v57 }
  0x37   :  { %581 = vmatprep.subr.bf16.mxu0 %v614_v58 }
  0x3a   :  { %582 = vmatpush3.bf16.msra.mxu0 %v614_v58 }
  0xef   :  { %v537_v29 = vpop.f32.mrb[0].mxu0 }
  0xf0   :  { %v133_v30 = vadd.f32 %v537_v29, %v476_v28  ;;  %v124_v31 = vpop.f32.mrb[1].mxu0 }
  0xf1   :  { %v125_v32 = vadd.f32 %v476_v28, %v124_v31  ;;  %v538_v33 = vpop.f32.mrb[2].mxu0 }
  0xf2   :  { %v136_v34 = vadd.f32 %v538_v33, %v476_v28  ;;  %v127_v35 = vpop.f32.mrb[3].mxu0  ;;  %v157_v37 = vmax.f32 %v133_v30, 0.0 }
  0xf3   :  { %v128_v36 = vadd.f32 %v476_v28, %v127_v35  ;;  %v155_v39 = vmax.f32 %v125_v32, 0.0 }
  0xf4   :  { %v158_v38 = vmax.f32 %v136_v34, 0.0 }
  0xf5   :  { %v156_v40 = vmax.f32 %v128_v36, 0.0 }
  0xf6   :  { %v164_v41 = vpack.c.bf16 %v158_v38, %v157_v37 }
  0xf7   :  { %v541_v42 = vpop.f32.mrb[4].mxu0  ;;  %v163_v43 = vpack.c.bf16 %v156_v40, %v155_v39 }
  0xf8   :  { %v149_v44 = vadd.f32 %v541_v42, %v476_v28  ;;  %v140_v45 = vpop.f32.mrb[5].mxu0 }
  0xf9   :  { %v141_v46 = vadd.f32 %v476_v28, %v140_v45  ;;  %v542_v47 = vpop.f32.mrb[6].mxu0  ;;  %559 = vmatprep.mubr.bf16.mxu1 %v163_v43 }
  0xfa   :  { %v152_v48 = vadd.f32 %v542_v47, %v476_v28  ;;  %v143_v49 = vpop.f32.mrb[7].mxu0  ;;  %560 = vmatmul.mubr.bf16.vlgmr.msra.gmra.mrb[0].mxu1 %v164_v41  ;;  %v161_v51 = vmax.f32 %v149_v44, 0.0 }
  0xfb   :  { %v144_v50 = vadd.f32 %v476_v28, %v143_v49  ;;  %v159_v53 = vmax.f32 %v141_v46, 0.0 }
  0xfc   :  { %v162_v52 = vmax.f32 %v152_v48, 0.0 }
  0xfd   :  { %v160_v54 = vmax.f32 %v144_v50, 0.0 }
  0xfe   :  { %v166_v55 = vpack.c.bf16 %v162_v52, %v161_v51 }
  0xff   :  { %v165_v56 = vpack.c.bf16 %v160_v54, %v159_v53 }
 0x101   :  { %563 = vmatprep.mubr.bf16.mxu1 %v165_v56 }
 0x102   :  { %564 = vmatmul.mubr.bf16.gmra.mrb[4].mxu1 %v166_v55 }
 0x1cd   :  { %v561_v60 = vpop.f32.mrb[0].mxu1 }
 0x1ce   :  { %v281_v61 = vadd.f32 %v561_v60, %v483_v59  ;;  %v272_v62 = vpop.f32.mrb[1].mxu1 }
 0x1cf   :  { %v273_v63 = vadd.f32 %v483_v59, %v272_v62  ;;  %v562_v0 = vpop.f32.mrb[2].mxu1 }
 0x1d0   :  { %v284_v1 = vadd.f32 %v562_v0, %v483_v59  ;;  %v275_v2 = vpop.f32.mrb[3].mxu1  ;;  %v305_v4 = vmax.f32 %v281_v61, 0.0 }
 0x1d1   :  { %v276_v3 = vadd.f32 %v483_v59, %v275_v2  ;;  %v303_v6 = vmax.f32 %v273_v63, 0.0 }
 0x1d2   :  { %v306_v5 = vmax.f32 %v284_v1, 0.0 }
 0x1d3   :  { %v304_v7 = vmax.f32 %v276_v3, 0.0 }
 0x1d4   :  { %v312_v8 = vpack.c.bf16 %v306_v5, %v305_v4 }
 0x1d5   :  { %v311_v9 = vpack.c.bf16 %v304_v7, %v303_v6  ;;  %v565_v10 = vpop.f32.mrb[4].mxu1 }
 0x1d6   :  { %v297_v11 = vadd.f32 %v565_v10, %v483_v59  ;;  %v288_v12 = vpop.f32.mrb[5].mxu1 }
 0x1d7   :  { %v289_v13 = vadd.f32 %v483_v59, %v288_v12  ;;  %v566_v14 = vpop.f32.mrb[6].mxu1  ;;  %583 = vmatprep.mubr.bf16.mxu0 %v311_v9 }
 0x1d8   :  { %v300_v15 = vadd.f32 %v566_v14, %v483_v59  ;;  %v291_v16 = vpop.f32.mrb[7].mxu1  ;;  %584 = vmatmul.mubr.bf16.vlgmr.msra.gmra.mrb[8].mxu0 %v312_v8  ;;  %v309_v18 = vmax.f32 %v297_v11, 0.0 }
 0x1d9   :  { %v292_v17 = vadd.f32 %v483_v59, %v291_v16  ;;  %v307_v20 = vmax.f32 %v289_v13, 0.0 }
 0x1da   :  { %v310_v19 = vmax.f32 %v300_v15, 0.0 }
 0x1db   :  { %v308_v21 = vmax.f32 %v292_v17, 0.0 }
 0x1dc   :  { %v314_v22 = vpack.c.bf16 %v310_v19, %v309_v18 }
 0x1dd   :  { %v313_v23 = vpack.c.bf16 %v308_v21, %v307_v20 }
 0x1df   :  { %587 = vmatprep.mubr.bf16.mxu0 %v313_v23 }
 0x1e0   :  { %588 = vmatmul.mubr.bf16.gmra.mrb[12].mxu0 %v314_v22 }
 0x2ab   :  { %v585_v25 = vpop.f32.mrb[8].mxu0 }
 0x2ac   :  { %v429_v26 = vadd.f32 %v585_v25, %v492_v24  ;;  %v420_v27 = vpop.f32.mrb[9].mxu0 }
 0x2ad   :  { %v421_v28 = vadd.f32 %v492_v24, %v420_v27  ;;  %v586_v29 = vpop.f32.mrb[10].mxu0 }
 0x2ae   :  { %453 = vst [vmem:[#allocation5 + $0x10] sm:$0xff] %v429_v26  ;;  %v432_v30 = vadd.f32 %v586_v29, %v492_v24  ;;  %v423_v31 = vpop.f32.mrb[11].mxu0 }
 0x2af   :  { %451 = vst [vmem:[#allocation5] sm:$0xff] %v421_v28  ;;  %v424_v32 = vadd.f32 %v492_v24, %v423_v31 }
 0x2b0   :  { %454 = vst [vmem:[#allocation5 + $0x18] sm:$0xff] %v432_v30 }
 0x2b1   :  { %452 = vst [vmem:[#allocation5 + $0x8] sm:$0xff] %v424_v32 }
 0x2b3   :  { %v589_v33 = vpop.f32.mrb[12].mxu0 }
 0x2b4   :  { %v445_v34 = vadd.f32 %v589_v33, %v492_v24  ;;  %v436_v35 = vpop.f32.mrb[13].mxu0 }
 0x2b5   :  { %v437_v36 = vadd.f32 %v492_v24, %v436_v35  ;;  %v590_v37 = vpop.f32.mrb[14].mxu0 }
 0x2b6   :  { %457 = vst [vmem:[#allocation5 + $0x30] sm:$0xff] %v445_v34  ;;  %v448_v38 = vadd.f32 %v590_v37, %v492_v24  ;;  %v439_v39 = vpop.f32.mrb[15].mxu0 }
 0x2b7   :  { %455 = vst [vmem:[#allocation5 + $0x20] sm:$0xff] %v437_v36  ;;  %v440_v40 = vadd.f32 %v492_v24, %v439_v39 }
 0x2b8   :  { %458 = vst [vmem:[#allocation5 + $0x38] sm:$0xff] %v448_v38 }
 0x2b9   :  { %456 = vst [vmem:[#allocation5 + $0x28] sm:$0xff] %v440_v40 }
 0x2ba   :  { %648 = shalt.err (!%p645_p12)
}
 0x2bb   :  { %s649_s30 = scalar_lea.hbm %s807_s7, 1024 }
 0x2bc   :  { %p650_p13 = scmp.ne.s32.totalorder %s807_s7, %s649_s30  ;;  %p653_p0 = scmp.lt.u32.totalorder %s649_s30, %s807_s7 }
 0x2be   :  { %p655_p1 = pnand %p653_p0, %p650_p13 }
 0x2c0   :  { %658 = shalt.err (!%p655_p1)
}
 0x2c1   :  { %s667_s12 = smov 128   ;;  %s668_s13 = smov 8  }
 0x2c2   :  { %470 = dma.vmem_to_hbm [thread:$0]  %s465_s27, 1024, %s807_s7, [#allocation4], %s667_s12, %s667_s12, %s668_s13  }
 0x2c3   :  { %661 = dma.done.wait [#allocation4], 1024  }
 0x2c4   :  { %662 = vsyncadd [#allocation4], 4294966272 }
 0x2c5   :  { %474 = vsyncpa [#allocation3], 1 }
 0x2c6   :  { %475 = vsyncpa [#allocation4], 1 }

</bundles_post_ra>
